<compile_context>
chip_gen: v7x
topology: tpu7x:2x2x1
jax: 0.10.0
libtpu: 0.0.40
codegen_flags: <defaults>
</compile_context>

<pallas_src>
import math
import numpy as np
import jax
import jax.numpy as jnp
from jax.experimental import pallas as pl
from jax.experimental.pallas import tpu as pltpu

BN_EPS = 1e-5
LANE = 128
NC = 2          # per-core partial-stats slots for pass 1 (v7x megacore; harmless on 1-TC chips)
TM_MAX = 1024   # ~86% of HBM roofline already at 1024-row tiles; bigger gives little


def _round_up(a, b):
    return (a + b - 1) // b * b


def _vmem_limit_bytes():
    """Per-generation scoped-VMEM limit (v7x: 64 MiB physical; v4/v5e/v6e: 128 MiB)."""
    try:
        cap = int(pltpu.get_tpu_info().vmem_capacity_bytes)
        if cap > 0:
            return int(min(max(cap // 2, 32 * 1024 * 1024), 96 * 1024 * 1024))
    except Exception:
        pass
    try:
        kind = jax.devices()[0].device_kind.lower()
    except Exception:
        kind = ""
    if ("v4" in kind) or ("v5" in kind) or ("v6" in kind):
        return 64 * 1024 * 1024
    return 32 * 1024 * 1024   # conservative default (covers v7x's 64 MiB physical)


def _pick_tm(M, K, Cout, itemsize, vmem_limit):
    """Derive the M-tile from a VMEM budget; round to sublane packing / MXU row multiples."""
    sub = 8 if itemsize >= 4 else 8 * (4 // itemsize)      # 8 for f32, 16 for bf16
    kp = _round_up(K, LANE)                                # VMEM lane-padded widths
    cp = _round_up(Cout, LANE)
    budget = vmem_limit // 2                               # headroom for compiler scratch
    resident = 2 * kp * cp * 4 + 2 * kp * kp * 4 + 8 * cp * 4
    per_row = 2 * kp * itemsize + 2 * cp * 4               # double-buffered x tile + out tile
    tm_cap = max(sub, (budget - resident) // per_row)
    tm_need = _round_up(max(1, (M + NC - 1) // NC), sub)   # don't tile finer than needed
    tm = int(min(tm_cap, tm_need, TM_MAX))
    if tm >= 256:
        tm = tm // 256 * 256                               # MXU row multiple (v6e/v7x)
    else:
        tm = max(sub, tm // sub * sub)
    return tm


# --------------------- Pass 1: X-side sufficient statistics (colsum + Gram) ---------------------
def _stats_kernel(x_ref, colsum_ref, gram_ref):
    i = pl.program_id(1)     # M-tile index within this core's slice ("arbitrary" axis)

    @pl.when(i == 0)
    def _init():
        colsum_ref[...] = jnp.zeros_like(colsum_ref)
        gram_ref[...] = jnp.zeros_like(gram_ref)

    x = x_ref[...]                                                       # [TM, K], matmul dtype
    colsum_ref[0] = colsum_ref[0] + jnp.sum(x.astype(jnp.float32), axis=0, keepdims=True)
    # Gram update on the MXU with the SAME operands the fused pass will use (stats consistency).
    gram_ref[0] = gram_ref[0] + jax.lax.dot_general(
        x, x, (((0,), (0,)), ((), ())), preferred_element_type=jnp.float32)


# --------------------- Pass 2: fused matmul + BN affine + PReLU, single store ---------------------
def _make_fused_kernel(linear: bool):
    def kernel(x_ref, w_ref, p_ref, o_ref):
        y = jnp.dot(x_ref[...], w_ref[...], preferred_element_type=jnp.float32)
        z = y * p_ref[0:1, :] + p_ref[1:2, :]                # pre-folded BN scale / shift
        if not linear:
            z = jnp.where(z > 0, z, p_ref[2:3, :] * z)       # PReLU (per-channel alpha)
        o_ref[...] = z.astype(o_ref.dtype)
    return kernel


def _im2col(x_nchw, k, s, p):
    """x: [N, C, H, W] -> patches [N*OH*OW, C*k*k] (C-major, then kh, kw)."""
    N, C, H, W = x_nchw.shape
    xp = jnp.pad(x_nchw, ((0, 0), (0, 0), (p, p), (p, p)))
    OH = (H + 2 * p - k) // s + 1
    OW = (W + 2 * p - k) // s + 1
    cols = []
    for ki in range(k):
        for kj in range(k):
            patch = xp[:, :, ki:ki + s * OH:s, kj:kj + s * OW:s]   # [N, C, OH, OW]
            cols.append(patch)
    stacked = jnp.stack(cols, axis=0)                        # [k*k, N, C, OH, OW]
    stacked = jnp.transpose(stacked, (1, 3, 4, 2, 0))        # [N, OH, OW, C, k*k]
    return stacked.reshape(N * OH * OW, C * k * k), OH, OW


def conv_block_forward(x, weight, gamma, beta, alpha, k, s, p,
                       dw=False, linear=False, matmul_dtype=jnp.bfloat16):
    """Forward of ConvBlock. x: [N, Cin, H, W] float32 NCHW. Returns NCHW float32."""
    if dw:
        # TODO(synk): depthwise (groups=inp) conv path not implemented; only dense conv.
        raise NotImplementedError("dw=True (grouped conv) not implemented")

    N, Cin, H, W = x.shape
    Cout = weight.shape[0]
    if alpha is None:
        alpha = jnp.zeros((Cout,), jnp.float32)

    # ---- im2col (wrapper side for now; see TODO above) ----
    xcol, OH, OW = _im2col(x.astype(jnp.float32), k, s, p)    # [M, K]
    M, K = xcol.shape
    itemsize = jnp.dtype(matmul_dtype).itemsize

    # ---- per-generation tile sizing / VMEM limit ----
    vmem_limit = _vmem_limit_bytes()
    TM = _pick_tm(M, K, Cout, itemsize, vmem_limit)
    M_pad = _round_up(M, NC * TM)                             # zero rows: exact no-op for stats
    if M_pad != M:
        xcol = jnp.pad(xcol, ((0, M_pad - M), (0, 0)))
    xcol = xcol.astype(matmul_dtype)

    w_mat = weight.reshape(Cout, -1).T.astype(jnp.float32)    # [K, Cout]
    w_in = w_mat.astype(matmul_dtype)

    n_per_core = M_pad // (NC * TM)
    n_tiles = M_pad // TM

    # ------------------------------ pass 1: colsum + Gram ------------------------------
    cost1 = pl.CostEstimate(
        flops=int(2 * M_pad * K * K + M_pad * K), transcendentals=0,
        bytes_accessed=int(M_pad * K * itemsize + NC * (K * K + K) * 4))

    colsum_parts, gram_parts = pl.pallas_call(
        _stats_kernel,
        out_shape=(jax.ShapeDtypeStruct((NC, 1, K), jnp.float32),
                   jax.ShapeDtypeStruct((NC, K, K), jnp.float32)),
        grid=(NC, n_per_core),
        in_specs=[pl.BlockSpec((TM, K), lambda c, i: (c * n_per_core + i, 0))],
        out_specs=[pl.BlockSpec((1, 1, K), lambda c, i: (c, 0, 0)),   # per-core partial slot
                   pl.BlockSpec((1, K, K), lambda c, i: (c, 0, 0))],  # per-core partial slot
        compiler_params=pltpu.CompilerParams(
            # c is race-free "parallel" (disjoint per-core stat slots); M axis stays "arbitrary"
            # because each core accumulates sequentially into its resident block.
            dimension_semantics=("parallel", "arbitrary"),
            vmem_limit_bytes=vmem_limit),
        cost_estimate=cost1,
    )(xcol)

    # ------------------- tiny wrapper-side BN fold (hoisted out of the tile loop) -------------------
    w_eff = w_in.astype(jnp.float32)                 # exactly the operand the MXU sees in pass 2
    colsum = jnp.sum(colsum_parts, axis=0)           # [1, K]
    gram = jnp.sum(gram_parts, axis=0)               # [K, K]
    inv_m = 1.0 / float(M)                           # divide by the REAL row count, not padded
    hi = jax.lax.Precision.HIGHEST
    mean = jnp.dot(colsum, w_eff, precision=hi) * inv_m                       # [1, Cout]
    ey2 = jnp.sum(jnp.dot(gram, w_eff, precision=hi) * w_eff,
                  axis=0, keepdims=True) * inv_m                              # [1, Cout]
    var = jnp.maximum(ey2 - mean * mean, 0.0)        # clamp vs. cancellation
    scale = gamma.reshape(1, -1).astype(jnp.float32) * jax.lax.rsqrt(var + BN_EPS)
    shift = beta.reshape(1, -1).astype(jnp.float32) - mean * scale
    params = jnp.concatenate(
        [scale, shift, alpha.reshape(1, -1).astype(jnp.float32)], axis=0)     # [3, Cout]

    # ------------------------------ pass 2: fused conv + BN + PReLU ------------------------------
    cost2 = pl.CostEstimate(
        flops=int(2 * M_pad * K * Cout + 4 * M_pad * Cout), transcendentals=0,
        bytes_accessed=int(M_pad * K * itemsize + K * Cout * itemsize
                           + 3 * Cout * 4 + M_pad * Cout * 4))

    out = pl.pallas_call(
        _make_fused_kernel(linear),
        out_shape=jax.ShapeDtypeStruct((M_pad, Cout), jnp.float32),
        grid=(n_tiles,),
        in_specs=[
            pl.BlockSpec((TM, K), lambda i: (i, 0)),           # X_col tile (pipelined)
            pl.BlockSpec((K, Cout), lambda i: (0, 0)),         # W resident (DMA'd once)
            pl.BlockSpec((3, Cout), lambda i: (0, 0)),         # folded scale/shift/alpha resident
        ],
        out_specs=pl.BlockSpec((TM, Cout), lambda i: (i, 0)),  # single store, no channel padding
        compiler_params=pltpu.CompilerParams(
            dimension_semantics=("parallel",),                 # rows split across TCs on v7x
            vmem_limit_bytes=vmem_limit),
        cost_estimate=cost2,
    )(xcol, w_in, params)

    out = out[:M]
    # [M, Cout] -> [N, OH, OW, Cout] -> NCHW (module contract requires NCHW output).
    return jnp.transpose(out.reshape(N, OH, OW, Cout), (0, 3, 1, 2))


def _reference_forward(x, weight, gamma, beta, alpha, k, s, p, linear=False):
    """Pure-JAX reference (same semantics as the PyTorch module in train mode)."""
    y = jax.lax.conv_general_dilated(
        x, weight, window_strides=(s, s), padding=[(p, p), (p, p)],
        dimension_numbers=("NCHW", "OIHW", "NCHW"))
    mean = jnp.mean(y, axis=(0, 2, 3), keepdims=True)
    var = jnp.mean((y - mean) ** 2, axis=(0, 2, 3), keepdims=True)
    y = (y - mean) * jax.lax.rsqrt(var + BN_EPS)
    y = y * gamma.reshape(1, -1, 1, 1) + beta.reshape(1, -1, 1, 1)
    if linear:
        return y
    a = alpha.reshape(1, -1, 1, 1)
    return jnp.where(y > 0, y, a * y)


if __name__ == "__main__":
    # ConvBlock(inp=4, oup=8, k=3, s=1, p=1, dw=False, linear=False)
    N, Cin, H, W = 2, 4, 16, 16
    Cout, k, s, p = 8, 3, 1, 1

    key = jax.random.PRNGKey(0)
    kx, kw, kg, kb = jax.random.split(key, 4)

    x = jax.random.normal(kx, (N, Cin, H, W), dtype=jnp.float32)
    fan_in = Cin * k * k
    weight = jax.random.normal(kw, (Cout, Cin, k, k), dtype=jnp.float32) * math.sqrt(2.0 / fan_in)
    gamma = 1.0 + 0.1 * jax.random.normal(kg, (Cout,), dtype=jnp.float32)   # BN weight
    beta = 0.1 * jax.random.normal(kb, (Cout,), dtype=jnp.float32)          # BN bias
    alpha = jnp.full((Cout,), 0.25, dtype=jnp.float32)                      # PReLU init

    ref = jax.block_until_ready(
        _reference_forward(x, weight, gamma, beta, alpha, k, s, p, linear=False))
    ref_lin = jax.block_until_ready(
        _reference_forward(x, weight, gamma, beta, alpha, k, s, p, linear=True))

    # f32 MXU path: tight parity with the PyTorch train-mode forward.
    out = jax.block_until_ready(conv_block_forward(
        x, weight, gamma, beta, alpha, k, s, p, dw=False, linear=False,
        matmul_dtype=jnp.float32))
    assert out.shape == (N, Cout, H, W), out.shape
    np.testing.assert_allclose(np.asarray(out), np.asarray(ref), rtol=1e-4, atol=1e-4)

    # linear=True branch.
    out_lin = jax.block_until_ready(conv_block_forward(
        x, weight, gamma, beta, alpha, k, s, p, dw=False, linear=True,
        matmul_dtype=jnp.float32))
    np.testing.assert_allclose(np.asarray(out_lin), np.asarray(ref_lin), rtol=1e-4, atol=1e-4)

    # Default bf16 MXU path (perf default on v5e/v6e/v7x); BN fold / accumulation stay f32.
    out_bf16 = jax.block_until_ready(conv_block_forward(
        x, weight, gamma, beta, alpha, k, s, p, dw=False, linear=False))
    np.testing.assert_allclose(np.asarray(out_bf16), np.asarray(ref), rtol=5e-2, atol=5e-2)

    print("KERNEL_OK")
</pallas_src>

<mosaic_0001>
module attributes {stable_mosaic.version = 11 : i64} {
  func.func @_stats_kernel(%arg0: i32, %arg1: i32, %arg2: memref<256x36xf32, #tpu.memory_space<vmem>>, %arg3: memref<1x1x36xf32, #tpu.memory_space<vmem>>, %arg4: memref<1x36x36xf32, #tpu.memory_space<vmem>>) attributes {dimension_semantics = [#tpu.dimension_semantics<parallel>, #tpu.dimension_semantics<arbitrary>], iteration_bounds = array<i64: 2, 1>, scalar_prefetch = 0 : i64, scratch_operands = 0 : i64, tpu.core_type = #tpu.core_type<tc>, window_params = [{transform_indices = @transform_0, window_bounds = array<i64: 256, 36>}, {transform_indices = @transform_1, window_bounds = array<i64: 1, 1, 36>}, {transform_indices = @transform_2, window_bounds = array<i64: 1, 36, 36>}]} {
    %c0_i32 = arith.constant 0 : i32
    %0 = arith.cmpi eq, %arg1, %c0_i32 : i32
    %1 = arith.extui %0 : i1 to i32
    %c0_i32_0 = arith.constant 0 : i32
    %2 = arith.cmpi ne, %1, %c0_i32_0 : i32
    scf.if %2 {
      %cst_15 = arith.constant 0.000000e+00 : f32
      %19 = vector.broadcast %cst_15 : f32 to vector<1x1x36xf32>
      %c0_16 = arith.constant 0 : index
      %c0_17 = arith.constant 0 : index
      %c0_18 = arith.constant 0 : index
      %20 = vector.load %arg3[%c0_16, %c0_17, %c0_18] : memref<1x1x36xf32, #tpu.memory_space<vmem>>, vector<1x1x36xf32>
      tpu.vector_store %arg3[%c0_16, %c0_17, %c0_18], %19 {strides = array<i32>} : memref<1x1x36xf32, #tpu.memory_space<vmem>>, vector<1x1x36xf32>,
      %cst_19 = arith.constant 0.000000e+00 : f32
      %21 = vector.broadcast %cst_19 : f32 to vector<1x36x36xf32>
      %c0_20 = arith.constant 0 : index
      %c0_21 = arith.constant 0 : index
      %c0_22 = arith.constant 0 : index
      %22 = vector.load %arg4[%c0_20, %c0_21, %c0_22] : memref<1x36x36xf32, #tpu.memory_space<vmem>>, vector<1x36x36xf32>
      tpu.vector_store %arg4[%c0_20, %c0_21, %c0_22], %21 {strides = array<i32>} : memref<1x36x36xf32, #tpu.memory_space<vmem>>, vector<1x36x36xf32>,
    } else {
    }
    %c0 = arith.constant 0 : index
    %c0_1 = arith.constant 0 : index
    %3 = vector.load %arg2[%c0, %c0_1] : memref<256x36xf32, #tpu.memory_space<vmem>>, vector<256x36xf32>
    %c0_2 = arith.constant 0 : index
    %c0_3 = arith.constant 0 : index
    %c0_4 = arith.constant 0 : index
    %4 = vector.load %arg3[%c0_2, %c0_3, %c0_4] : memref<1x1x36xf32, #tpu.memory_space<vmem>>, vector<1x1x36xf32>
    %5 = vector.shape_cast %4 : vector<1x1x36xf32> to vector<1x36xf32>
    %cst = arith.constant dense<0.000000e+00> : vector<36xf32>
    %6 = vector.multi_reduction <add>, %3, %cst [0] : vector<256x36xf32> to vector<36xf32>
    %7 = vector.shape_cast %6 : vector<36xf32> to vector<1x36xf32>
    %8 = arith.addf %5, %7 : vector<1x36xf32>
    %c0_5 = arith.constant 0 : index
    %c0_6 = arith.constant 0 : index
    %c0_7 = arith.constant 0 : index
    %9 = vector.load %arg3[%c0_5, %c0_6, %c0_7] : memref<1x1x36xf32, #tpu.memory_space<vmem>>, vector<1x1x36xf32>
    %10 = vector.shape_cast %9 : vector<1x1x36xf32> to vector<1x36xf32>
    %11 = vector.shape_cast %8 : vector<1x36xf32> to vector<1x1x36xf32>
    tpu.vector_store %arg3[%c0_5, %c0_6, %c0_7], %11 {strides = array<i32>} : memref<1x1x36xf32, #tpu.memory_space<vmem>>, vector<1x1x36xf32>,
    %c0_8 = arith.constant 0 : index
    %c0_9 = arith.constant 0 : index
    %c0_10 = arith.constant 0 : index
    %12 = vector.load %arg4[%c0_8, %c0_9, %c0_10] : memref<1x36x36xf32, #tpu.memory_space<vmem>>, vector<1x36x36xf32>
    %13 = vector.shape_cast %12 : vector<1x36x36xf32> to vector<36x36xf32>
    %cst_11 = arith.constant dense<0.000000e+00> : vector<36x36xf32>
    %14 = tpu.matmul %3, %3, %cst_11 {dimension_numbers = #tpu.dot_dimension_numbers<[0], [0], [1], [1], [0, 1, 1, 1], [], []>} : vector<256x36xf32>, vector<256x36xf32>, vector<36x36xf32> -> vector<36x36xf32>
    %15 = arith.addf %13, %14 : vector<36x36xf32>
    %c0_12 = arith.constant 0 : index
    %c0_13 = arith.constant 0 : index
    %c0_14 = arith.constant 0 : index
    %16 = vector.load %arg4[%c0_12, %c0_13, %c0_14] : memref<1x36x36xf32, #tpu.memory_space<vmem>>, vector<1x36x36xf32>
    %17 = vector.shape_cast %16 : vector<1x36x36xf32> to vector<36x36xf32>
    %18 = vector.shape_cast %15 : vector<36x36xf32> to vector<1x36x36xf32>
    tpu.vector_store %arg4[%c0_12, %c0_13, %c0_14], %18 {strides = array<i32>} : memref<1x36x36xf32, #tpu.memory_space<vmem>>, vector<1x36x36xf32>,
    return
  }
  func.func @transform_0(%arg0: i32, %arg1: i32) -> (i32, i32) {
    %c1_i32 = arith.constant 1 : i32
    %0 = arith.muli %arg0, %c1_i32 : i32
    %1 = arith.addi %0, %arg1 : i32
    %c0_i32 = arith.constant 0 : i32
    %c0_i32_0 = arith.constant 0 : i32
    return %1, %c0_i32 : i32, i32
  }
  func.func @transform_1(%arg0: i32, %arg1: i32) -> (i32, i32, i32) {
    %c0_i32 = arith.constant 0 : i32
    %c0_i32_0 = arith.constant 0 : i32
    %c0_i32_1 = arith.constant 0 : i32
    return %arg0, %c0_i32, %c0_i32_0 : i32, i32, i32
  }
  func.func @transform_2(%arg0: i32, %arg1: i32) -> (i32, i32, i32) {
    %c0_i32 = arith.constant 0 : i32
    %c0_i32_0 = arith.constant 0 : i32
    %c0_i32_1 = arith.constant 0 : i32
    return %arg0, %c0_i32, %c0_i32_0 : i32, i32, i32
  }
}

</mosaic_0001>

<bundles_post_ra>
// kernel: tpu_custom_call.1
= control target key start
LH: loop header
LB: loop body
LE: loop exit
PB: predicated region body
PF: predicated region fallthrough
CT: control target
= control target key end

     0   :  { %8 = vsyncpa [#allocation3], 0  ;;  %s1193_s0 = inlined_call_operand.vmem [shape: f32[512,36], index: 0, kind: input, shape index: {}]   ;;  %s1194_s1 = inlined_call_operand.hbm [shape: f32[2,1,36], index: 1, kind: output, shape index: {0}]   ;;  %s1195_s2 = inlined_call_operand.vmem [shape: f32[2,36,36], index: 2, kind: output, shape index: {1}]  }
   0x1   :  { %10 = vsyncpa [#allocation3 + $0x1], 0  ;;  %s890_s9 = smov 0   ;;  %s892_s10 = smov 0  }
   0x2   :  { %s894_s11 = smov 0   ;;  %s896_s12 = smov 0  }
   0x3   :  { %s898_s13 = smov 0   ;;  %s900_s14 = smov 0  }
   0x4 LB: > { %s573_s15 = sadd.s32 4294967295, %s871_s14   ;;  %s574_s16 = sadd.s32 4294967294, %s871_s14   ;;  %s871_s14 = sphi %s900_s14, %s16_s14   ;;  %s867_s13 = sphi %s898_s13, %s1202_s13   ;;  %s863_s12 = sphi %s896_s12, %s1201_s12   ;;  %s859_s11 = sphi %s894_s11, %s1200_s11   ;;  %s855_s10 = sphi %s892_s10, %s1199_s10   ;;  %s851_s9 = sphi %s890_s9, %s1198_s9  }
   0x5   : > { %s28_s17 = sadd.s32 1, %s867_s13  ;;  %s63_s18 = sadd.s32 1, %s859_s11 }
   0x6   : > { %p30_p0 = scmp.ge.s32.totalorder %s28_s17, 2  ;;  %p73_p1 = scmp.ne.s32.totalorder %s859_s11, %s855_s10 }
   0x7   : > { %p74_p2 = scmp.eq.s32.totalorder %s573_s15, 1  ;;  %p79_p3 = scmp.ne.s32.totalorder %s855_s10, %s851_s9 }
   0x8   : > { %s1204_s17 = smov (%p30_p0, %s28_s17), 0  ;;  %p80_p5 = scmp.eq.s32.totalorder %s574_s16, 1 }
   0x9   : > { %p930_p4 = por %p74_p2, %p73_p1  ;;  %s60_s20 = ssub.s32 %s867_s13, %s1204_s17 }
   0xa   : > { %p577_p6 = scmp.ge.s32.totalorder %s871_s14, 1  ;;  %p61_p7 = scmp.eq.s32.totalorder %s60_s20, 0 }
   0xb   : > { %p937_p8 = por %p80_p5, %p79_p3  ;;  %p135_p9 = scmp.lt.s32.totalorder %s871_s14, 3 }
   0xc   : > { %s943_s22 = scalar_select %p61_p7, %s859_s11, %s63_s18  }
   0xd   : > { %p136_p10 = pnand %p577_p6, %p135_p9 }
   0xe   : > { %s578_s23 = sshll.u32 (!%p136_p10), %s863_s12, 5  ;;  %vm181_vm0 = vcmask (!%p136_p10), 293888   ;;  %p170_p12 = scmp.lt.s32.totalorder (!%p136_p10), %s863_s12, 1  ;;  %vm179_vm1 = vcmask (!%p136_p10), 286720   ;;  %vm186_vm2 = vcmask (!%p136_p10), 289792  }
   0xf   : > { %139 = sbr.rel (%p136_p10) target bundleno = 395 (0x18b), region = 24  ;;  %p164_p11 = scmp.lt.s32.totalorder (!%p136_p10), %s578_s23, 63 }
  0x10   : > { %s153_s5 = sand.u32 (!%p136_p10), 1, %s855_s10   ;;  %s581_s7 = sshll.u32 (!%p136_p10), %s863_s12, 4 }
  0x11   : > { %s154_s6 = scalar_lea.vmem (!%p136_p10), [#allocation2], %s153_s5  ;;  %s1137_s18 = scalar_lea.hbm (!%p136_p10), %s1194_s1, %s581_s7 }
  0x12   : > { %s482_s8 = sshll.u32 (!%p136_p10), %s154_s6, 4  ;;  %s465_s20 = scalar_lea.sflag (!%p136_p10), [#allocation3], %s153_s5  ;;  %s483_s8 = int_to_ptr.vmem [resolvable:$true] %s482_s8 }
  0x16   : > { %s1206_s23 = smov (!%p164_p11, %s578_s23), 63 }
  0x17   : > { %s579_s24 = sshll.u32 %s1206_s23, 3  ;;  %s793_s23 = scalar_lea.vmem %s483_s8, 16 }
  0x18   : > { %s949_s27 = scalar_lea.vmem %s1193_s0, %s579_s24  ;;  %p794_p13 = scmp.ne.s32.totalorder %s483_s8, %s793_s23 }
  0x19   : > { %v188_v0 = vld [vmem:[%s949_s27] sm:$0xff]  ;;  %v189_v2 = vld [vmem:[%s949_s27 + $0x8] sm:$0xff]  ;;  %v190_v8 = vld [vmem:[%s949_s27 + $0x10] sm:$0xff]  ;;  %s171_s28 = scalar_select %p170_p12, %s863_s12, 1 }
  0x1a   : > { %v953_v1 = vld [vmem:[%s949_s27 + $0x80] sm:$0xff]  ;;  %v222_v4 = vsel %vm181_vm0, %v188_v0, 0.0  ;;  %v959_v5 = vld [vmem:[%s949_s27 + $0x88] sm:$0xff]  ;;  %v223_v6 = vsel %vm181_vm0, %v189_v2, 0.0  ;;  %v225_v10 = vsel %vm181_vm0, %v190_v8, 0.0  ;;  %v191_v11 = vld [vmem:[%s949_s27 + $0x18] sm:$0xff]  ;;  %v633_v38 = vpack.c.bf16 %v189_v2, %v188_v0  ;;  %p795_p0 = pnand %p794_p13, %p930_p4 }
  0x1b   : > { %v736_v3 = vpack.i.bf16 %v188_v0, %v953_v1  ;;  %v224_v7 = vadd.f32 %v223_v6, %v222_v4  ;;  %v738_v9 = vpack.i.bf16 %v189_v2, %v959_v5  ;;  %v967_v12 = vld [vmem:[%s949_s27 + $0x90] sm:$0xff]  ;;  %v227_v14 = vsel %vm181_vm0, %v191_v11, 0.0  ;;  %v192_v15 = vld [vmem:[%s949_s27 + $0x20] sm:$0xff]  ;;  %v193_v18 = vld [vmem:[%s949_s27 + $0x28] sm:$0xff]  ;;  %s679_s29 = smul.u32 40, %s171_s28  ;;  %s874_s24 = smov [#allocation2]  }
  0x1c   : > { %v229_v16 = vsel %vm181_vm0, %v192_v15, 0.0  ;;  %v740_v19 = vpack.i.bf16 %v190_v8, %v967_v12  ;;  %v231_v20 = vsel %vm181_vm0, %v193_v18, 0.0  ;;  %v976_v21 = vld [vmem:[%s949_s27 + $0x98] sm:$0xff]  ;;  %v979_v23 = vld [vmem:[%s949_s27 + $0x30] sm:$0xff]  ;;  %v990_v29 = vld [vmem:[%s949_s27 + $0xa0] sm:$0xff]  ;;  %v631_v35 = vpack.c.bf16 %v959_v5, %v953_v1  ;;  %p796_p1 = pneg %p795_p0  ;;  %s797_s25 = sshll.u32 %s874_s24, 4  ;;  %s798_s25 = int_to_ptr.vmem [resolvable:$false] %s797_s25 }
  0x1d   : > { %737 = vxpose.xlu0.b32.start [1/16] (narrow) %v736_v3, 40  ;;  %v226_v13 = vadd.f32 %v225_v10, %v224_v7  ;;  %v233_v24 = vsel %vm181_vm0, %v979_v23, 0.0  ;;  %v984_v26 = vld [vmem:[%s949_s27 + $0x38] sm:$0xff]  ;;  %v742_v27 = vpack.i.bf16 %v191_v11, %v976_v21  ;;  %v993_v31 = vld [vmem:[%s949_s27 + $0x40] sm:$0xff]  ;;  %v998_v34 = vld [vmem:[%s949_s27 + $0x48] sm:$0xff]  ;;  %v744_v36 = vpack.i.bf16 %v192_v15, %v990_v29  ;;  %s1120_s4 = scalar_lea.vmem %s1195_s2, %s679_s29  ;;  %s799_s26 = scalar_lea.vmem %s798_s25, 32 }
  0x1e   : > { %v235_v28 = vsel %vm181_vm0, %v984_v26, 0.0  ;;  %v237_v32 = vsel %vm181_vm0, %v993_v31, 0.0  ;;  %v239_v37 = vsel %vm181_vm0, %v998_v34, 0.0  ;;  %v635_v39 = vpack.c.bf16 %v976_v21, %v967_v12  ;;  %v1008_v40 = vld [vmem:[%s949_s27 + $0xa8] sm:$0xff]  ;;  %v1011_v42 = vld [vmem:[%s949_s27 + $0x50] sm:$0xff]  ;;  %632 = vmatprep.subr.bf16.mxu0 %v631_v35  ;;  %663 = vmatprep.subr.bf16.mxu1 %v631_v35  ;;  %v1016_v46 = vld [vmem:[%s949_s27 + $0x58] sm:$0xff]  ;;  %p800_p2 = scmp.lt.s32.totalorder %s483_s8, %s798_s25  ;;  %p801_p3 = scmp.lt.s32.totalorder %s799_s26, %s793_s23 }
  0x1f   : > { %v228_v17 = vadd.f32 %v227_v14, %v226_v13  ;;  %v241_v43 = vsel %vm181_vm0, %v1011_v42, 0.0  ;;  %634 = vmatpush3.bf16.msra.mxu0 %v633_v38  ;;  %v637_v44 = vpack.c.bf16 %v191_v11, %v190_v8  ;;  %671 = vmatpush3.bf16.msra.mxu1 %v633_v38  ;;  %v639_v47 = vpack.c.bf16 %v1008_v40, %v990_v29  ;;  %v1024_v50 = vld [vmem:[%s949_s27 + $0xb0] sm:$0xff]  ;;  %v1027_v52 = vld [vmem:[%s949_s27 + $0x60] sm:$0xff]  ;;  %v1030_v53 = vld [vmem:[%s949_s27 + $0xb8] sm:$0xff] }
  0x20   : > { %636 = vmatprep.subr.bf16.mxu0 %v635_v39  ;;  %664 = vmatprep.subr.bf16.mxu1 %v635_v39  ;;  %v746_v48 = vpack.i.bf16 %v193_v18, %v1008_v40  ;;  %v243_v49 = vsel %vm181_vm0, %v1016_v46, 0.0  ;;  %v245_v54 = vsel %vm181_vm0, %v1027_v52, 0.0  ;;  %v641_v55 = vpack.c.bf16 %v193_v18, %v192_v15  ;;  %v1035_v57 = vld [vmem:[%s949_s27 + $0x68] sm:$0xff]  ;;  %v1044_v62 = vld [vmem:[%s949_s27 + $0x70] sm:$0xff]  ;;  %v1047_v63 = vld [vmem:[%s949_s27 + $0xc0] sm:$0xff]  ;;  %p802_p5 = por %p801_p3, %p800_p2 }
  0x21   : > { %739 = vxpose.xlu0.b32.cont [2/16] (narrow) %v738_v9, 40  ;;  %v230_v22 = vadd.f32 %v229_v16, %v228_v17  ;;  %v643_v58 = vpack.c.bf16 %v1030_v53, %v1024_v50  ;;  %v748_v59 = vpack.i.bf16 %v979_v23, %v1024_v50  ;;  %v247_v60 = vsel %vm181_vm0, %v1035_v57, 0.0  ;;  %v1050_v0 = vld [vmem:[%s949_s27 + $0xc8] sm:$0xff]  ;;  %v1057_v6 = vld [vmem:[%s949_s27 + $0x78] sm:$0xff]  ;;  %v214_v13 = vld [vmem:[%s949_s27 + $0xd0] sm:$0xff] }
  0x22   : > { %v249_v2 = vsel %vm181_vm0, %v1044_v62, 0.0  ;;  %v645_v3 = vpack.c.bf16 %v984_v26, %v979_v23  ;;  %v647_v7 = vpack.c.bf16 %v1050_v0, %v1047_v63  ;;  %v750_v8 = vpack.i.bf16 %v984_v26, %v1030_v53  ;;  %v215_v14 = vld [vmem:[%s949_s27 + $0xd8] sm:$0xff]  ;;  %v217_v23 = vld [vmem:[%s949_s27 + $0xe8] sm:$0xff]  ;;  %p803_p6 = pnand %p802_p5, %p796_p1 }
  0x23   : > { %v232_v25 = vadd.f32 %v231_v20, %v230_v22  ;;  %638 = vmatpush3.bf16.msra.mxu0 %v637_v44  ;;  %672 = vmatpush3.bf16.msra.mxu1 %v637_v44  ;;  %v251_v9 = vsel %vm181_vm0, %v1057_v6, 0.0  ;;  %v253_v11 = vsel %vm181_vm0, %v953_v1, 0.0  ;;  %v649_v15 = vpack.c.bf16 %v998_v34, %v993_v31  ;;  %v216_v22 = vld [vmem:[%s949_s27 + $0xe0] sm:$0xff] }
  0x24   : > { %640 = vmatprep.subr.bf16.mxu0 %v639_v47  ;;  %665 = vmatprep.subr.bf16.mxu1 %v639_v47  ;;  %v651_v17 = vpack.c.bf16 %v215_v14, %v214_v13  ;;  %v255_v18 = vsel %vm181_vm0, %v959_v5, 0.0  ;;  %v257_v20 = vsel %vm181_vm0, %v967_v12, 0.0  ;;  %v655_v5 = vpack.c.bf16 %v217_v23, %v216_v22 }
  0x25   : > { %741 = vxpose.xlu0.b32.cont [3/16] (narrow) %v740_v19, 40  ;;  %v234_v30 = vadd.f32 %v233_v24, %v232_v25  ;;  %v752_v19 = vpack.i.bf16 %v993_v31, %v1047_v63  ;;  %v653_v24 = vpack.c.bf16 %v1016_v46, %v1011_v42  ;;  %v259_v26 = vsel %vm181_vm0, %v976_v21, 0.0  ;;  %v219_v31 = vld [vmem:[%s949_s27 + $0xf8] sm:$0xff] }
  0x26   : > { %v263_v21 = vsel %vm181_vm0, %v1008_v40, 0.0  ;;  %v267_v39 = vsel %vm181_vm0, %v1030_v53, 0.0  ;;  %v758_v40 = vpack.i.bf16 %v1016_v46, %v215_v14  ;;  %v271_v44 = vsel %vm181_vm0, %v1050_v0, 0.0 }
  0x27   : > { %v236_v33 = vadd.f32 %v235_v28, %v234_v30  ;;  %642 = vmatpush3.bf16.msra.mxu0 %v641_v55  ;;  %673 = vmatpush3.bf16.msra.mxu1 %v641_v55  ;;  %v261_v28 = vsel %vm181_vm0, %v990_v29, 0.0  ;;  %v218_v30 = vld [vmem:[%s949_s27 + $0xf0] sm:$0xff]  ;;  %v265_v29 = vsel %vm181_vm0, %v1024_v50, 0.0  ;;  %v275_v50 = vsel %vm181_vm0, %v215_v14, 0.0 }
  0x28   : > { %644 = vmatprep.subr.bf16.mxu0 %v643_v58  ;;  %666 = vmatprep.subr.bf16.mxu1 %v643_v58  ;;  %v659_v35 = vpack.c.bf16 %v219_v31, %v218_v30  ;;  %v762_v46 = vpack.i.bf16 %v1035_v57, %v217_v23  ;;  %v277_v53 = vsel %vm181_vm0, %v216_v22, 0.0  ;;  %v279_v55 = vsel %vm181_vm0, %v217_v23, 0.0 }
  0x29   : > { %743 = vxpose.xlu0.b32.cont [4/16] (narrow) %v742_v27, 40  ;;  %v238_v41 = vadd.f32 %v237_v32, %v236_v33  ;;  %v754_v27 = vpack.i.bf16 %v998_v34, %v1050_v0  ;;  %v657_v32 = vpack.c.bf16 %v1035_v57, %v1027_v52  ;;  %v756_v34 = vpack.i.bf16 %v1011_v42, %v214_v13 }
  0x2a   : > { %v269_v42 = vsel %vm181_vm0, %v1047_v63, 0.0 }
  0x2b   : > { %v240_v45 = vadd.f32 %v239_v37, %v238_v41  ;;  %646 = vmatpush3.bf16.msra.mxu0 %v645_v3  ;;  %674 = vmatpush3.bf16.msra.mxu1 %v645_v3  ;;  %v661_v37 = vpack.c.bf16 %v1057_v6, %v1044_v62 }
  0x2c   : > { %648 = vmatprep.subr.bf16.mxu0 %v647_v7  ;;  %667 = vmatprep.subr.bf16.mxu1 %v647_v7 }
  0x2d   : > { %745 = vxpose.xlu0.b32.cont [5/16] (narrow) %v744_v36, 40  ;;  %v242_v51 = vadd.f32 %v241_v43, %v240_v45  ;;  %v760_v45 = vpack.i.bf16 %v1027_v52, %v216_v22  ;;  %v281_v52 = vsel %vm181_vm0, %v218_v30, 0.0 }
  0x2f   : > { %v244_v56 = vadd.f32 %v243_v49, %v242_v51  ;;  %650 = vmatpush3.bf16.msra.mxu0 %v649_v15  ;;  %675 = vmatpush3.bf16.msra.mxu1 %v649_v15 }
  0x30   : > { %652 = vmatprep.subr.bf16.mxu0 %v651_v17  ;;  %668 = vmatprep.subr.bf16.mxu1 %v651_v17  ;;  %v873_v17 = vmov 0.0  }
  0x31   : > { %747 = vxpose.xlu0.b32.cont [6/16] (narrow) %v746_v48, 40  ;;  %v246_v61 = vadd.f32 %v245_v54, %v244_v56  ;;  %v273_v48 = vsel %vm181_vm0, %v214_v13, 0.0  ;;  %v764_v56 = vpack.i.bf16 %v1044_v62, %v218_v30  ;;  %182 = vst.msk [vmem:[%s1120_s4] sm:$0xff] %vm181_vm0, %v873_v17  ;;  %183 = vst.msk [vmem:[%s1120_s4 + $0x8] sm:$0xff] %vm181_vm0, %v873_v17 }
  0x32   : > { %184 = vst.msk [vmem:[%s1120_s4 + $0x10] sm:$0xff] %vm181_vm0, %v873_v17  ;;  %185 = vst.msk [vmem:[%s1120_s4 + $0x18] sm:$0xff] %vm181_vm0, %v873_v17 }
  0x33   : > { %v248_v4 = vadd.f32 %v247_v60, %v246_v61  ;;  %654 = vmatpush3.bf16.msra.mxu0 %v653_v24  ;;  %676 = vmatpush3.bf16.msra.mxu1 %v653_v24  ;;  %v283_v60 = vsel %vm181_vm0, %v219_v31, 0.0  ;;  %v766_v61 = vpack.i.bf16 %v1057_v6, %v219_v31  ;;  %180 = vst.msk [vmem:[%s154_s6] sm:$0x1] %vm179_vm1, %v873_v17 }
  0x34   : > { %656 = vmatprep.subr.bf16.mxu0 %v655_v5  ;;  %669 = vmatprep.subr.bf16.mxu1 %v655_v5  ;;  %187 = vst.msk [vmem:[%s1120_s4 + $0x20] sm:$0xf] %vm186_vm2, %v873_v17 }
  0x35   : > { %749 = vxpose.xlu0.b32.cont [7/16] (narrow) %v748_v59, 40  ;;  %v250_v10 = vadd.f32 %v249_v2, %v248_v4 }
  0x37   : > { %v252_v16 = vadd.f32 %v251_v9, %v250_v10  ;;  %658 = vmatpush3.bf16.msra.mxu0 %v657_v32  ;;  %677 = vmatpush3.bf16.msra.mxu1 %v657_v32 }
  0x38   : > { %660 = vmatprep.subr.bf16.mxu0 %v659_v35  ;;  %670 = vmatprep.subr.bf16.mxu1 %v659_v35 }
  0x39   : > { %751 = vxpose.xlu0.b32.cont [8/16] (narrow) %v750_v8, 40  ;;  %v254_v1 = vadd.f32 %v253_v11, %v252_v16 }
  0x3a   : > { %v220_v24 = vld [vmem:[%s154_s6] sm:$0x1] }
  0x3b   : > { %v256_v25 = vadd.f32 %v255_v18, %v254_v1  ;;  %662 = vmatpush3.bf16.msra.mxu0 %v661_v37  ;;  %678 = vmatpush3.bf16.msra.mxu1 %v661_v37 }
  0x3d   : > { %753 = vxpose.xlu0.b32.cont [9/16] (narrow) %v752_v19, 40  ;;  %v258_v12 = vadd.f32 %v257_v20, %v256_v25 }
  0x3f   : > { %v260_v33 = vadd.f32 %v259_v26, %v258_v12 }
  0x41   : > { %755 = vxpose.xlu0.b32.cont [10/16] (narrow) %v754_v27, 40  ;;  %v262_v36 = vadd.f32 %v261_v28, %v260_v33 }
  0x43   : > { %v264_v38 = vadd.f32 %v263_v21, %v262_v36 }
  0x45   : > { %757 = vxpose.xlu0.b32.cont [11/16] (narrow) %v756_v34, 40  ;;  %v266_v41 = vadd.f32 %v265_v29, %v264_v38 }
  0x47   : > { %v268_v43 = vadd.f32 %v267_v39, %v266_v41 }
  0x49   : > { %759 = vxpose.xlu0.b32.cont [12/16] (narrow) %v758_v40, 40  ;;  %v270_v47 = vadd.f32 %v269_v42, %v268_v43 }
  0x4b   : > { %v272_v49 = vadd.f32 %v271_v44, %v270_v47 }
  0x4d   : > { %761 = vxpose.xlu0.b32.cont [13/16] (narrow) %v760_v45, 40  ;;  %v274_v51 = vadd.f32 %v273_v48, %v272_v49 }
  0x4f   : > { %v276_v54 = vadd.f32 %v275_v50, %v274_v51 }
  0x51   : > { %763 = vxpose.xlu0.b32.cont [14/16] (narrow) %v762_v46, 40  ;;  %v278_v58 = vadd.f32 %v277_v53, %v276_v54 }
  0x53   : > { %v280_v59 = vadd.f32 %v279_v55, %v278_v58 }
  0x55   : > { %765 = vxpose.xlu0.b32.cont [15/16] (narrow) %v764_v56, 40  ;;  %v282_v63 = vadd.f32 %v281_v52, %v280_v59 }
  0x57   : > { %v284_v57 = vadd.f32 %v283_v60, %v282_v63 }
  0x59   : > { %767 = vxpose.xlu0.b32.end [16/16] (narrow) %v766_v61, 40  ;;  %v285_v18 = vrot.slane %v284_v57, 4 }
  0x5b   : > { %v286_v19 = vadd.f32 %v285_v18, %v284_v57 }
  0x5d   : > { %v287_v1 = vrot.slane %v286_v19, 2 }
  0x5f   : > { %v288_v20 = vadd.f32 %v287_v1, %v286_v19 }
  0x61   : > { %v289_v22 = vrot.slane %v288_v20, 1 }
  0x63   : > { %v290_v23 = vadd.f32 %v289_v22, %v288_v20 }
  0x65   : > { %v291_v25 = vadd.f32 %v290_v23, %v220_v24 }
  0x67   : > { %293 = vst.msk [vmem:[%s154_s6] sm:$0x1] %vm179_vm1, %v291_v25 }
  0x9d   : > { %v768_v0 = vpop.trf.xlu0 }
  0x9e   : > { %v769_v2 = vunpack.i.l.bf16 %v768_v0  ;;  %v772_v3 = vunpack.i.h.bf16 %v768_v0 }
  0xa0   : > { %427 = vmatprep.mubr.f32.mxu0 %v769_v2 }
  0xa1   : > { %v773_v4 = vpop.trf.xlu0  ;;  %428 = vmatmul.mubr.f32.vlgmr.msra.gmra.mrb[0].mxu0 %v772_v3 }
  0xa2   : > { %v774_v7 = vunpack.i.l.bf16 %v773_v4  ;;  %v777_v62 = vunpack.i.h.bf16 %v773_v4 }
  0xa4   : > { %432 = vmatprep.mubr.f32.mxu0 %v774_v7 }
  0xa5   : > { %v778_v8 = vpop.trf.xlu0  ;;  %433 = vmatmul.mubr.f32.gmra.mrb[2].mxu0 %v777_v62 }
  0xa6   : > { %v779_v9 = vunpack.i.l.bf16 %v778_v8  ;;  %v782_v10 = vunpack.i.h.bf16 %v778_v8 }
  0xa8   : > { %437 = vmatprep.mubr.f32.mxu0 %v779_v9 }
  0xa9   : > { %v783_v6 = vpop.trf.xlu0  ;;  %438 = vmatmul.mubr.f32.gmra.mrb[4].mxu0 %v782_v10 }
  0xaa   : > { %v784_v11 = vunpack.i.l.bf16 %v783_v6  ;;  %v787_v13 = vunpack.i.h.bf16 %v783_v6 }
  0xac   : > { %442 = vmatprep.mubr.f32.mxu1 %v784_v11 }
  0xad   : > { %v788_v14 = vpop.trf.xlu0  ;;  %443 = vmatmul.mubr.f32.vlgmr.msra.gmra.mrb[0].mxu1 %v787_v13 }
  0xae   : > { %v792_v15 = vunpack.i.h.bf16 %v788_v14  ;;  %v789_v16 = vunpack.i.l.bf16 %v788_v14 }
  0xb0   : > { %447 = vmatprep.mubr.f32.mxu1 %v789_v16 }
  0xb1   : > { %448 = vmatmul.mubr.f32.gmra.mrb[2].mxu1 %v792_v15 }
  0xb2   : > { %806 = shalt.err (!%p803_p6)
}
  0xb3   : > { %s807_s12 = scalar_lea.hbm %s1137_s18, 16  ;;  %s811_s29 = scalar_lea.hbm %s1194_s1, 32 }
  0xb4   : > { %p808_p7 = scmp.ne.s32.totalorder %s1137_s18, %s807_s12  ;;  %p812_p11 = scmp.lt.u32.totalorder %s1137_s18, %s1194_s1 }
  0xb5   : > { %p813_p12 = scmp.lt.u32.totalorder %s811_s29, %s807_s12  ;;  %p815_p0 = scmp.lt.u32.totalorder %s807_s12, %s1137_s18 }
  0xb6   : > { %p809_p9 = pnand %p808_p7, %p930_p4 }
  0xb7   : > { %p814_p13 = por %p813_p12, %p812_p11 }
  0xb8   : > { %p810_p10 = pneg %p809_p9 }
  0xb9   : > { %p816_p1 = por %p815_p0, %p814_p13 }
  0xbb   : > { %p817_p2 = pnand %p816_p1, %p810_p10 }
  0xbd   : > { %820 = shalt.err (!%p817_p2)
}
  0xbe   : > { %680 = dma.vmem_to_hbm [thread:$0]  (%p930_p4), %s483_s8, 16, %s1137_s18, %s465_s20   ;;  %v294_v26 = vld [vmem:[%s1120_s4] sm:$0xff]  ;;  %v295_v31 = vld [vmem:[%s1120_s4 + $0x8] sm:$0xff]  ;;  %v296_v34 = vld [vmem:[%s1120_s4 + $0x10] sm:$0xff] }
  0xbf   : > { %v297_v39 = vld [vmem:[%s1120_s4 + $0x18] sm:$0xff]  ;;  %v298_v44 = vld [vmem:[%s1120_s4 + $0x20] sm:$0xf] }
 0x174   : > { %v616_v5 = vpop.f32.mrb[0].mxu0 }
 0x175   : > { %v617_v27 = vpop.f32.mrb[1].mxu0 }
 0x176   : > { %v618_v12 = vadd.f32 %v617_v27, %v616_v5 }
 0x178   : > { %v453_v28 = vadd.f32 %v618_v12, %v294_v26  ;;  %v619_v30 = vpop.f32.mrb[2].mxu0 }
 0x179   : > { %v620_v32 = vpop.f32.mrb[3].mxu0 }
 0x17a   : > { %458 = vst.msk [vmem:[%s1120_s4] sm:$0xff] %vm181_vm0, %v453_v28  ;;  %v621_v33 = vadd.f32 %v620_v32, %v619_v30 }
 0x17c   : > { %v454_v35 = vadd.f32 %v621_v33, %v295_v31  ;;  %v622_v21 = vpop.f32.mrb[4].mxu0 }
 0x17d   : > { %v623_v36 = vpop.f32.mrb[5].mxu0 }
 0x17e   : > { %459 = vst.msk [vmem:[%s1120_s4 + $0x8] sm:$0xff] %vm181_vm0, %v454_v35  ;;  %v624_v29 = vadd.f32 %v623_v36, %v622_v21 }
 0x180   : > { %v455_v37 = vadd.f32 %v624_v29, %v296_v34  ;;  %v625_v38 = vpop.f32.mrb[0].mxu1 }
 0x181   : > { %v626_v40 = vpop.f32.mrb[1].mxu1 }
 0x182   : > { %460 = vst.msk [vmem:[%s1120_s4 + $0x10] sm:$0xff] %vm181_vm0, %v455_v37  ;;  %v627_v41 = vadd.f32 %v626_v40, %v625_v38 }
 0x184   : > { %v456_v42 = vadd.f32 %v627_v41, %v297_v39  ;;  %v628_v43 = vpop.f32.mrb[2].mxu1 }
 0x185   : > { %v629_v45 = vpop.f32.mrb[3].mxu1 }
 0x186   : > { %461 = vst.msk [vmem:[%s1120_s4 + $0x18] sm:$0xff] %vm181_vm0, %v456_v42  ;;  %v630_v47 = vadd.f32 %v629_v45, %v628_v43 }
 0x188   : > { %v457_v48 = vadd.f32 %v630_v47, %v298_v44 }
 0x18a   : > { %463 = vst.msk [vmem:[%s1120_s4 + $0x20] sm:$0xf] %vm186_vm2, %v457_v48 }
 0x18b PF: > { %p686_p4 = scmp.ge.s32.totalorder %s871_s14, 2  ;;  %s497_s19 = sand.u32 1, %s851_s9  }
 0x18c   : > { %s498_s5 = scalar_lea.sflag [#allocation3], %s497_s19 }
 0x18d   : > { %p683_p3 = pnand %p686_p4, %p937_p8 }
 0x18f   : > { %846 = dma.done.wait (!%p683_p3), %s498_s5, 16  }
 0x190   : > { %848 = vsyncadd (!%p683_p3), %s498_s5, 4294967280  ;;  %s16_s14 = sadd.s32 1, %s871_s14   ;;  %s1198_s9 = smov %s855_s10 }
 0x191   : > { %p13_p5 = scmp.ge.s32.totalorder %s16_s14, 4   ;;  %s1199_s10 = smov %s859_s11 }
 0x192   : > { %s1200_s11 = smov %s943_s22  ;;  %s1201_s12 = smov %s867_s13 }
 0x193   : > { %s1202_s13 = smov %s1204_s17  ;;  %15 = sbr.rel (!%p13_p5) target bundleno = 4 (0x4), region = 75 }
 0x19a   :  { %510 = vsyncpa [#allocation3], 1 }
 0x19b   :  { %512 = vsyncpa [#allocation3 + $0x1], 1 }

</bundles_post_ra>
